<compile_context>
chip_gen: v5e
topology: v5e:2x2
jax: 0.10.0
libtpu: 0.0.40
codegen_flags: <defaults>
</compile_context>

<pallas_src>
import numpy as np
import jax
import jax.numpy as jnp
from jax.experimental import pallas as pl
from jax.experimental.pallas import tpu as pltpu


def make_delta_weight(seqL: int) -> np.ndarray:
    """Matches the PyTorch __init__ exactly (host-side constants)."""
    w = np.ones(seqL, np.float32) / (seqL / 2.0)
    w[: seqL // 2] *= -1.0
    return w


def _round_up(x: int, m: int) -> int:
    return ((x + m - 1) // m) * m


def _sublane_multiple(itemsize: int) -> int:
    # Physical sublane packing: f32 -> 8, bf16/f16 -> 16, int8/fp8 -> 32.
    return {4: 8, 2: 16, 1: 32}.get(itemsize, 8)


def _vmem_capacity_bytes() -> int:
    try:
        return int(pltpu.get_tpu_info().vmem_capacity_bytes)
    except Exception:
        return 64 << 20  # conservative fallback: v7x per-TensorCore VMEM


def _analyze_weight(w_host: np.ndarray):
    seqL = int(w_host.shape[0])
    half = seqL // 2
    c = float(w_host[-1])
    structured = (
        half >= 1
        and c != 0.0
        and np.allclose(w_host[:half], -c)
        and np.allclose(w_host[half:], c)
    )
    return seqL, half, c, structured, tuple(float(v) for v in w_host)


def _weighted_reduce(sl, w_host: np.ndarray):
    """sl(s) -> f32 tile of x at seq step s; returns the weighted sum tile."""
    seqL, half, c, structured, w = _analyze_weight(w_host)
    if structured:
        # Delta weights are (-c,...,-c, c,...,c): one add per element plus a
        # single final scale instead of a mul+add per seq step.
        pos = sl(half)
        for s in range(half + 1, seqL):
            pos = pos + sl(s)
        neg = sl(0)
        for s in range(1, half):
            neg = neg + sl(s)
        return (pos - neg) * c
    acc = sl(0) * w[0]
    for s in range(1, seqL):
        acc = acc + sl(s) * w[s]
    return acc


def _make_kernel_flat(w_host: np.ndarray, inDims: int):
    def kernel(x_ref, o_ref):
        # x_ref: (tb, seqL*inDims) lane-dense VMEM tile; o_ref: (tb, inDims).
        def sl(s):
            return x_ref[:, s * inDims:(s + 1) * inDims].astype(jnp.float32)
        o_ref[...] = _weighted_reduce(sl, w_host).astype(o_ref.dtype)
    return kernel


def _make_kernel_tiled(w_host: np.ndarray):
    def kernel(x_ref, o_ref):
        # x_ref: (tb, seqL, tn) VMEM tile; o_ref: (tb, tn).
        def sl(s):
            return x_ref[:, s, :].astype(jnp.float32)
        o_ref[...] = _weighted_reduce(sl, w_host).astype(o_ref.dtype)
    return kernel


def delta_forward(x, weight, *, block_bytes=None, vmem_limit_bytes=None):
    """x: [B, seqL, inDims]; weight: host array [seqL] -> [B, inDims] (f32)."""
    B, seqL, inDims = x.shape
    w_host = np.asarray(weight, dtype=np.float32)
    assert w_host.shape == (seqL,)

    in_itemsize = jnp.dtype(x.dtype).itemsize
    out_dtype = jnp.result_type(x.dtype, jnp.float32)  # torch f32-weight matmul parity
    out_itemsize = jnp.dtype(out_dtype).itemsize
    sub = _sublane_multiple(in_itemsize)

    capacity = _vmem_capacity_bytes()
    if block_bytes is None:
        # Per-input-buffer budget: ~4-8 MiB already sits at the HBM roofline;
        # capacity/16 keeps double-buffering small vs physical VMEM
        # (4 MiB on v7x's 64 MiB per TC, 8 MiB on v5e/v6e's 128 MiB).
        block_bytes = min(8 << 20, capacity // 16)

    F = seqL * inDims
    F_pad = _round_up(F, 128)

    # ---- preferred path: batch-tiled, lane-dense 2-D layout ----------------
    row_bytes = F_pad * in_itemsize                     # pad-aware row size
    tb_cap = (block_bytes // row_bytes // sub) * sub    # rows per block

    if tb_cap >= sub or inDims <= 128:
        tb_cap = max(tb_cap, sub)
        # Aim for >= ~8 grid steps on big batches so the "parallel" batch axis
        # can shard across both v7x TensorCores (harmless on 1-TC chips).
        tb_target = _round_up(max(pl.cdiv(B, 8), 1), sub)
        tb = min(tb_cap, tb_target)
        if tb >= B:
            tb = B

        in_block_bytes = _round_up(max(tb, 1), sub) * F_pad * in_itemsize
        out_block_bytes = _round_up(max(tb, 1), 8) * _round_up(inDims, 128) * out_itemsize

        grid = (pl.cdiv(B, tb),)
        operand = x.reshape(B, F)                       # free, HBM-contiguous
        kernel = _make_kernel_flat(w_host, inDims)
        in_specs = [pl.BlockSpec((tb, F), lambda i: (i, 0))]
        out_specs = pl.BlockSpec((tb, inDims), lambda i: (i, 0))
        dim_sem = ("parallel",)
    else:
        # ---- fallback: a single row exceeds the budget -> tile features ----
        seqL_pad = _round_up(seqL, sub)
        tn_cap = (block_bytes // (sub * seqL_pad * 128 * in_itemsize)) * 128
        tn = max(128, min(tn_cap, _round_up(inDims, 128)))
        if tn >= inDims:
            tn = inDims
        tn_pad = _round_up(tn, 128)
        tb_cap = max(sub, (block_bytes // (seqL_pad * tn_pad * in_itemsize) // sub) * sub)
        tb = min(tb_cap, _round_up(max(pl.cdiv(B, 4), 1), sub))
        if tb >= B:
            tb = B

        in_block_bytes = max(tb, 1) * seqL_pad * tn_pad * in_itemsize
        out_block_bytes = _round_up(max(tb, 1), 8) * tn_pad * out_itemsize

        grid = (pl.cdiv(B, tb), pl.cdiv(inDims, tn))
        operand = x
        kernel = _make_kernel_tiled(w_host)
        in_specs = [pl.BlockSpec((tb, seqL, tn), lambda i, j: (i, 0, j))]
        out_specs = pl.BlockSpec((tb, tn), lambda i, j: (i, j))
        dim_sem = ("parallel", "parallel")

    if vmem_limit_bytes is None:
        # double-buffered input + output blocks + slack for Mosaic scratch
        needed = 2 * in_block_bytes + 2 * out_block_bytes + (8 << 20)
        vmem_limit_bytes = min(max(32 << 20, needed), capacity)

    cost = pl.CostEstimate(
        flops=2 * B * seqL * inDims,
        transcendentals=0,
        bytes_accessed=B * seqL * inDims * in_itemsize + B * inDims * out_itemsize,
    )

    return pl.pallas_call(
        kernel,
        out_shape=jax.ShapeDtypeStruct((B, inDims), out_dtype),
        grid=grid,
        in_specs=in_specs,
        out_specs=out_specs,
        compiler_params=pltpu.CompilerParams(
            dimension_semantics=dim_sem,
            vmem_limit_bytes=int(vmem_limit_bytes),
        ),
        cost_estimate=cost,
    )(operand)


def delta_reference(x, weight):
    # Pure-JAX reference mirroring torch: matmul(x.permute(0,2,1), w)
    return jnp.einsum("bsd,s->bd", x.astype(jnp.float32),
                      jnp.asarray(weight, jnp.float32))


if __name__ == "__main__":
    # Small shape consistent with the module: batch=2, seqL=8, inDims=32.
    B, seqL, inDims = 2, 8, 32
    w = make_delta_weight(seqL)

    x = jax.random.normal(jax.random.PRNGKey(0), (B, seqL, inDims), dtype=jnp.float32)
    out = jax.block_until_ready(delta_forward(x, w))
    ref = delta_reference(x, w)
    assert out.shape == (B, inDims), out.shape
    np.testing.assert_allclose(np.asarray(out), np.asarray(ref), rtol=1e-5, atol=1e-5)

    # Multi-step batch grid with a partial last block (B=20 -> tb=8 -> 3 steps).
    B2 = 20
    x2 = jax.random.normal(jax.random.PRNGKey(1), (B2, seqL, inDims), dtype=jnp.float32)
    out2 = jax.block_until_ready(delta_forward(x2, w))
    np.testing.assert_allclose(np.asarray(out2), np.asarray(delta_reference(x2, w)),
                               rtol=1e-5, atol=1e-5)

    # Feature-tiled fallback path (a single row deliberately exceeds the tiny
    # forced budget -> 2-D grid, 128-lane feature tiles, partial last blocks).
    B3, D3 = 16, 256
    x3 = jax.random.normal(jax.random.PRNGKey(2), (B3, seqL, D3), dtype=jnp.float32)
    out3 = jax.block_until_ready(delta_forward(x3, w, block_bytes=32 * 1024))
    np.testing.assert_allclose(np.asarray(out3), np.asarray(delta_reference(x3, w)),
                               rtol=1e-5, atol=1e-5)

    print("KERNEL_OK")
</pallas_src>

<mosaic_0001>
module attributes {stable_mosaic.version = 11 : i64} {
  func.func @kernel(%arg0: i32, %arg1: memref<2x256xf32, #tpu.memory_space<vmem>>, %arg2: memref<2x32xf32, #tpu.memory_space<vmem>>) attributes {dimension_semantics = [#tpu.dimension_semantics<parallel>], iteration_bounds = array<i64: 1>, scalar_prefetch = 0 : i64, scratch_operands = 0 : i64, tpu.core_type = #tpu.core_type<tc>, window_params = [{transform_indices = @transform_0, window_bounds = array<i64: 2, 256>}, {transform_indices = @transform_1, window_bounds = array<i64: 2, 32>}]} {
    %c0 = arith.constant 0 : index
    %c128 = arith.constant 128 : index
    %0 = vector.load %arg1[%c0, %c128] : memref<2x256xf32, #tpu.memory_space<vmem>>, vector<2x32xf32>
    %c0_0 = arith.constant 0 : index
    %c160 = arith.constant 160 : index
    %1 = vector.load %arg1[%c0_0, %c160] : memref<2x256xf32, #tpu.memory_space<vmem>>, vector<2x32xf32>
    %2 = arith.addf %0, %1 : vector<2x32xf32>
    %c0_1 = arith.constant 0 : index
    %c192 = arith.constant 192 : index
    %3 = vector.load %arg1[%c0_1, %c192] : memref<2x256xf32, #tpu.memory_space<vmem>>, vector<2x32xf32>
    %4 = arith.addf %2, %3 : vector<2x32xf32>
    %c0_2 = arith.constant 0 : index
    %c224 = arith.constant 224 : index
    %5 = vector.load %arg1[%c0_2, %c224] : memref<2x256xf32, #tpu.memory_space<vmem>>, vector<2x32xf32>
    %6 = arith.addf %4, %5 : vector<2x32xf32>
    %c0_3 = arith.constant 0 : index
    %c0_4 = arith.constant 0 : index
    %7 = vector.load %arg1[%c0_3, %c0_4] : memref<2x256xf32, #tpu.memory_space<vmem>>, vector<2x32xf32>
    %c0_5 = arith.constant 0 : index
    %c32 = arith.constant 32 : index
    %8 = vector.load %arg1[%c0_5, %c32] : memref<2x256xf32, #tpu.memory_space<vmem>>, vector<2x32xf32>
    %9 = arith.addf %7, %8 : vector<2x32xf32>
    %c0_6 = arith.constant 0 : index
    %c64 = arith.constant 64 : index
    %10 = vector.load %arg1[%c0_6, %c64] : memref<2x256xf32, #tpu.memory_space<vmem>>, vector<2x32xf32>
    %11 = arith.addf %9, %10 : vector<2x32xf32>
    %c0_7 = arith.constant 0 : index
    %c96 = arith.constant 96 : index
    %12 = vector.load %arg1[%c0_7, %c96] : memref<2x256xf32, #tpu.memory_space<vmem>>, vector<2x32xf32>
    %13 = arith.addf %11, %12 : vector<2x32xf32>
    %14 = arith.subf %6, %13 : vector<2x32xf32>
    %cst = arith.constant 2.500000e-01 : f32
    %15 = vector.broadcast %cst : f32 to vector<2x32xf32>
    %16 = arith.mulf %14, %15 : vector<2x32xf32>
    %c0_8 = arith.constant 0 : index
    %c0_9 = arith.constant 0 : index
    %17 = vector.load %arg2[%c0_8, %c0_9] : memref<2x32xf32, #tpu.memory_space<vmem>>, vector<2x32xf32>
    tpu.vector_store %arg2[%c0_8, %c0_9], %16 {strides = array<i32>} : memref<2x32xf32, #tpu.memory_space<vmem>>, vector<2x32xf32>,
    return
  }
  func.func @transform_0(%arg0: i32) -> (i32, i32) {
    %c0_i32 = arith.constant 0 : i32
    %c0_i32_0 = arith.constant 0 : i32
    return %arg0, %c0_i32 : i32, i32
  }
  func.func @transform_1(%arg0: i32) -> (i32, i32) {
    %c0_i32 = arith.constant 0 : i32
    %c0_i32_0 = arith.constant 0 : i32
    return %arg0, %c0_i32 : i32, i32
  }
}

</mosaic_0001>

<bundles_post_ra>
// kernel: tpu_custom_call.1
= control target key start
LH: loop header
LB: loop body
LE: loop exit
PB: predicated region body
PF: predicated region fallthrough
CT: control target
= control target key end

     0   :  { %6 = vsyncpa [#allocation3], 0  ;;  %s150_s0 = inlined_call_operand.hbm [shape: f32[2,256], index: 0, kind: input, shape index: {}]   ;;  %s151_s1 = inlined_call_operand.hbm [shape: f32[2,32], index: 1, kind: output, shape index: {}]  }
   0x1   :  { %7 = vsyncpa [#allocation4], 0  ;;  %s13_s8 = sshll.u32 %s150_s0, 4  ;;  %s129_s9 = smov [#allocation2]   ;;  %s14_s8 = int_to_ptr.hbm [resolvable:$true] %s13_s8 }
   0x2   :  { %s15_s10 = sshll.u32 %s129_s9, 4  ;;  %s16_s10 = int_to_ptr.vmem [resolvable:$true] %s15_s10 }
   0x3   :  { %18 = dma.hbm_to_vmem [thread:$0]  %s14_s8, 64, %s16_s10, [#allocation3]  }
   0x4   :  { %125 = dma.done.wait [#allocation3], 64  }
   0x5   :  { %126 = vsyncadd [#allocation3], 4294967232  ;;  %v23_v0 = vld [vmem:[#allocation2 + $0x2] sm:$0x3]  ;;  %s130_s11 = smov 96   ;;  %s131_s12 = smov 64  }
   0x6   :  { %25 = vrot.lane.b32.xlu0 %v23_v0, %s130_s11  ;;  %29 = vrot.lane.b32.xlu1 %v23_v0, %s131_s12  ;;  %s132_s13 = smov 32   ;;  %v37_v1 = vld [vmem:[#allocation2] sm:$0x3]  ;;  %s133_s0 = smov [#allocation5]   ;;  %vm53_vm0 = vcmask 254976  }
   0x7   :  { %33 = vrot.lane.b32.xlu2 %v23_v0, %s132_s13  ;;  %s60_s14 = sshll.u32 %s133_s0, 4  ;;  %s62_s17 = sshll.u32 %s151_s1, 4  ;;  %s61_s14 = int_to_ptr.vmem [resolvable:$true] %s60_s14  ;;  %s63_s17 = int_to_ptr.hbm [resolvable:$true] %s62_s17 }
   0xe   :  { %39 = vrot.lane.b32.xlu0 %v37_v1, %s130_s11  ;;  %43 = vrot.lane.b32.xlu1 %v37_v1, %s131_s12 }
   0xf   :  { %47 = vrot.lane.b32.xlu2 %v37_v1, %s132_s13 }
  0x61   :  { %v34_v2 = vpop.permute.xlu2 %33 }
  0x69   :  { %v48_v10 = vpop.permute.xlu2 %47 }
  0x78   :  { %v26_v3 = vpop.permute.xlu0 %25  ;;  %v30_v4 = vpop.permute.xlu1 %29 }
  0x79   :  { %v28_v5 = vadd.f32 %v26_v3, %v23_v0 }
  0x7b   :  { %v32_v8 = vadd.f32 %v30_v4, %v28_v5 }
  0x7d   :  { %v36_v12 = vadd.f32 %v34_v2, %v32_v8 }
  0x80   :  { %v40_v6 = vpop.permute.xlu0 %39  ;;  %v44_v7 = vpop.permute.xlu1 %43 }
  0x81   :  { %v42_v9 = vadd.f32 %v40_v6, %v37_v1 }
  0x83   :  { %v46_v11 = vadd.f32 %v44_v7, %v42_v9 }
  0x85   :  { %v50_v13 = vadd.f32 %v48_v10, %v46_v11 }
  0x87   :  { %v51_v14 = vsub.f32 %v36_v12, %v50_v13 }
  0x89   :  { %v52_v15 = vmul.f32 0.25, %v51_v14 }
  0x8b   :  { %54 = vst.msk [vmem:[#allocation5] sm:$0x3] %vm53_vm0, %v52_v15 }
  0x8c   :  { %65 = dma.vmem_to_hbm [thread:$0]  %s61_s14, 32, %s63_s17, [#allocation4]  }
  0x8d   :  { %127 = dma.done.wait [#allocation4], 32  }
  0x8e   :  { %128 = vsyncadd [#allocation4], 4294967264 }
  0x8f   :  { %70 = vsyncpa [#allocation3], 1 }
  0x90   :  { %71 = vsyncpa [#allocation4], 1 }

</bundles_post_ra>
